<compile_context>
chip_gen: v7x
topology: tpu7x:2x2x1
jax: 0.10.0
libtpu: 0.0.40
codegen_flags: <defaults>
</compile_context>

<pallas_src>
import jax
import jax.numpy as jnp
from jax import lax
from jax.experimental import pallas as pl
from jax.experimental.pallas import tpu as pltpu


def _make_fused_kernel(tile_n, num_tiles, n_valid, n_pad, eps):
    """Builds the fused reduce->BN->ReLU->span kernel (shapes/constants baked in)."""
    need_mask = (n_pad != n_valid)
    inv_n = 1.0 / float(n_valid)
    last_tile = num_tiles - 1

    def kernel(x_ref, wr_ref, ws_ref, g_ref, b_ref, o_ref, y_ref, mu_ref, iv_ref):
        p = pl.program_id(0)          # phase: 0 = matmul+sum, 1 = variance, 2 = bn+relu+span
        i = pl.program_id(1)          # row tile
        row0 = pl.multiple_of(i * tile_n, 8)

        def mask_rows(v):
            # zero out contributions from padded rows (only needed when n_pad != N)
            if not need_mask:
                return v
            rid = lax.broadcasted_iota(jnp.int32, v.shape, 0) + i * tile_n
            return jnp.where(rid < n_valid, v, 0.0)

        # ---- phase 0: Y = X @ Wr (AvgPool already folded into Wr), accumulate sum ----
        @pl.when(p == 0)
        def _reduce_and_sum():
            @pl.when(i == 0)
            def _():
                mu_ref[...] = jnp.zeros_like(mu_ref)
                iv_ref[...] = jnp.zeros_like(iv_ref)

            y = jnp.dot(x_ref[...], wr_ref[...], preferred_element_type=jnp.float32)
            y_ref[pl.ds(row0, tile_n), :] = y
            mu_ref[...] += jnp.sum(mask_rows(y), axis=0, keepdims=True)

            @pl.when(i == last_tile)
            def _():
                mu_ref[...] = mu_ref[...] * inv_n          # -> mean

        # ---- phase 1: accumulate sum((y - mean)^2) (two-pass variance) ----
        @pl.when(p == 1)
        def _variance():
            d = y_ref[pl.ds(row0, tile_n), :] - mu_ref[...]
            iv_ref[...] += jnp.sum(mask_rows(d * d), axis=0, keepdims=True)

            @pl.when(i == last_tile)
            def _():
                iv_ref[...] = lax.rsqrt(iv_ref[...] * inv_n + eps)   # -> inv_std

        # ---- phase 2: BatchNorm(affine) + ReLU + span matmul -> output tile ----
        @pl.when(p == 2)
        def _bn_relu_span():
            y = y_ref[pl.ds(row0, tile_n), :]
            yn = (y - mu_ref[...]) * (iv_ref[...] * g_ref[...]) + b_ref[...]
            yn = jnp.maximum(yn, 0.0)                       # f32 elementwise math (v5e safe)
            o_ref[...] = jnp.dot(yn.astype(ws_ref.dtype), ws_ref[...],
                                 preferred_element_type=jnp.float32).astype(o_ref.dtype)

    return kernel


def patch_embed_forward(x, w_reduce, w_span, *, stride, eps=1e-5,
                        bn_gamma=None, bn_beta=None,
                        compute_dtype=jnp.bfloat16, tile_rows=2048):
    """x: [B, C_in, H, W] (NCHW).  w_reduce: [C_mid, C_in], w_span: [C_out, C_mid].

    Returns [B, (H//stride)*(W//stride), C_out] in `compute_dtype`.
    """
    B, C_in, H, W = x.shape
    C_mid, C_in_w = w_reduce.shape
    C_out = w_span.shape[0]
    s = stride
    assert C_in_w == C_in
    assert H % s == 0 and W % s == 0, "AvgPool(kernel=stride) assumes divisible H, W"
    Hs, Ws = H // s, W // s
    N = B * Hs * Ws
    K = C_in * s * s

    # --- glue (single XLA pass over x): space-to-depth + channels-last -> [N, C_in*s*s].
    # The AvgPool mean is folded into the reduce weights below.
    x_s2d = (x.reshape(B, C_in, Hs, s, Ws, s)
               .transpose(0, 2, 4, 1, 3, 5)
               .reshape(N, K)
               .astype(compute_dtype))

    # --- tiling: few, large row tiles; rows padded up to tile_n*num_tiles (stats masked).
    num_tiles = pl.cdiv(N, max(8, tile_rows))
    tile_n = ((pl.cdiv(N, num_tiles) + 7) // 8) * 8
    n_pad = tile_n * num_tiles
    if n_pad != N:
        x_s2d = jnp.pad(x_s2d, ((0, n_pad - N), (0, 0)))

    # reduce conv weight, expanded over the pooling window (k = c*s*s + dh*s + dw).
    wr_k = (jnp.repeat(w_reduce.T.astype(jnp.float32), s * s, axis=0)
            / float(s * s)).astype(compute_dtype)                    # [K, C_mid]
    ws_t = w_span.T.astype(compute_dtype)                             # [C_mid, C_out]
    gamma = (jnp.ones((1, C_mid), jnp.float32) if bn_gamma is None
             else jnp.asarray(bn_gamma, jnp.float32).reshape(1, C_mid))
    beta = (jnp.zeros((1, C_mid), jnp.float32) if bn_beta is None
            else jnp.asarray(bn_beta, jnp.float32).reshape(1, C_mid))

    # --- VMEM budget: resident Y (f32, lane-padded to 128) + double-buffered x/z tiles.
    item = jnp.dtype(compute_dtype).itemsize
    y_bytes = n_pad * 128 * 4
    io_bytes = 2 * 2 * tile_n * 128 * item
    est = y_bytes + io_bytes + (1 << 20)
    assert est < 48 * 2**20, (
        "resident-Y plan exceeds the per-core VMEM budget (v7x has 64 MiB physical); "
        "lower tile_rows or stream Y through HBM for this problem size")
    vmem_limit = int(min(60 * 2**20, max(32 * 2**20, 2 * est)))

    kernel = _make_fused_kernel(tile_n, num_tiles, N, n_pad, eps)
    last_tile = num_tiles - 1

    z = pl.pallas_call(
        kernel,
        out_shape=jax.ShapeDtypeStruct((n_pad, C_out), compute_dtype),
        grid_spec=pltpu.PrefetchScalarGridSpec(
            num_scalar_prefetch=0,
            grid=(3, num_tiles),          # (phase, row-tile), both sequential
            in_specs=[
                # x tiles only stream during phase 0; afterwards the index is held constant
                # so no redundant DMAs are issued.
                pl.BlockSpec((tile_n, K),
                             lambda p, i: (jnp.where(p == 0, i, last_tile), 0)),
                pl.BlockSpec((K, C_mid), lambda p, i: (0, 0)),
                pl.BlockSpec((C_mid, C_out), lambda p, i: (0, 0)),
                pl.BlockSpec((1, C_mid), lambda p, i: (0, 0)),
                pl.BlockSpec((1, C_mid), lambda p, i: (0, 0)),
            ],
            # output blocks only advance during phase 2 -> each block written back exactly once.
            out_specs=pl.BlockSpec((tile_n, C_out),
                                   lambda p, i: (jnp.where(p == 2, i, 0), 0)),
            scratch_shapes=[
                pltpu.VMEM((n_pad, C_mid), jnp.float32),   # resident Y
                pltpu.VMEM((1, C_mid), jnp.float32),       # sum -> mean
                pltpu.VMEM((1, C_mid), jnp.float32),       # sumsq -> inv_std
            ],
        ),
        compiler_params=pltpu.CompilerParams(
            dimension_semantics=("arbitrary", "arbitrary"),
            vmem_limit_bytes=vmem_limit,
        ),
    )(x_s2d, wr_k, ws_t, gamma, beta)

    if n_pad != N:
        z = z[:N]
    # rearrange 'B C H W -> B (H W) C' is just a reshape of the channels-last flat layout;
    # self.norm is nn.Identity() (norm_layer=False).
    return z.reshape(B, Hs * Ws, C_out)


def ref_forward(x, w_reduce, w_span, *, stride, eps=1e-5):
    """Pure-JAX f32 reference matching the PyTorch forward (training-mode BatchNorm)."""
    B, C, H, W = x.shape
    s = stride
    Hs, Ws = H // s, W // s
    xp = x.reshape(B, C, Hs, s, Ws, s).mean(axis=(3, 5))
    y = jnp.einsum('bchw,mc->bmhw', xp, w_reduce)
    mean = y.mean(axis=(0, 2, 3), keepdims=True)
    var = ((y - mean) ** 2).mean(axis=(0, 2, 3), keepdims=True)
    yn = jnp.maximum((y - mean) / jnp.sqrt(var + eps), 0.0)
    z = jnp.einsum('bmhw,om->bohw', yn, w_span)
    return z.transpose(0, 2, 3, 1).reshape(B, Hs * Ws, -1)


if __name__ == "__main__":
    # Module config: in_channels=4, out_channels=32, patch_size=3 (unused in forward),
    # stride=2, reduce_ratio=4, bias=False, norm_layer=False.
    B, C_in, H, W = 2, 4, 16, 16
    C_out, reduce_ratio, stride = 32, 4, 2
    C_mid = C_out // reduce_ratio

    key = jax.random.PRNGKey(0)
    kx, kr, ks = jax.random.split(key, 3)
    x = jax.random.normal(kx, (B, C_in, H, W), jnp.float32)
    # Deterministic weights for the two 1x1 Conv2d layers (bias=False), squeezed to 2D.
    w_reduce = jax.random.normal(kr, (C_mid, C_in), jnp.float32) * 0.1   # [C_mid, C_in, 1, 1]
    w_span = jax.random.normal(ks, (C_out, C_mid), jnp.float32) * 0.1    # [C_out, C_mid, 1, 1]

    ref = ref_forward(x, w_reduce, w_span, stride=stride)

    # Default path: bf16 streams, f32 accumulation / BN math.
    out = jax.block_until_ready(
        patch_embed_forward(x, w_reduce, w_span, stride=stride))
    assert out.shape == (B, (H // stride) * (W // stride), C_out), out.shape
    assert jnp.allclose(out.astype(jnp.float32), ref, atol=3e-2, rtol=3e-2)

    # f32 path for a tight numerical check of the fused kernel itself.
    out_f32 = jax.block_until_ready(
        patch_embed_forward(x, w_reduce, w_span, stride=stride,
                            compute_dtype=jnp.float32))
    assert jnp.allclose(out_f32, ref, atol=1e-3, rtol=1e-3)

    print("KERNEL_OK")
</pallas_src>

<mosaic_0001>
module attributes {stable_mosaic.version = 11 : i64} {
  func.func @kernel(%arg0: i32, %arg1: i32, %arg2: memref<128x16xbf16, #tpu.memory_space<vmem>>, %arg3: memref<16x8xbf16, #tpu.memory_space<vmem>>, %arg4: memref<8x32xbf16, #tpu.memory_space<vmem>>, %arg5: memref<1x8xf32, #tpu.memory_space<vmem>>, %arg6: memref<1x8xf32, #tpu.memory_space<vmem>>, %arg7: memref<128x32xbf16, #tpu.memory_space<vmem>>, %arg8: memref<128x8xf32, #tpu.memory_space<vmem>>, %arg9: memref<1x8xf32, #tpu.memory_space<vmem>>, %arg10: memref<1x8xf32, #tpu.memory_space<vmem>>) attributes {dimension_semantics = [#tpu.dimension_semantics<arbitrary>, #tpu.dimension_semantics<arbitrary>], iteration_bounds = array<i64: 3, 1>, scalar_prefetch = 0 : i64, scratch_operands = 3 : i64, tpu.core_type = #tpu.core_type<tc>, window_params = [{transform_indices = @transform_0, window_bounds = array<i64: 128, 16>}, {pipeline_mode = #tpu.pipeline_mode<synchronous>, transform_indices = @transform_1, window_bounds = array<i64: 16, 8>}, {pipeline_mode = #tpu.pipeline_mode<synchronous>, transform_indices = @transform_2, window_bounds = array<i64: 8, 32>}, {pipeline_mode = #tpu.pipeline_mode<synchronous>, transform_indices = @transform_3, window_bounds = array<i64: 1, 8>}, {pipeline_mode = #tpu.pipeline_mode<synchronous>, transform_indices = @transform_4, window_bounds = array<i64: 1, 8>}, {transform_indices = @transform_5, window_bounds = array<i64: 128, 32>}]} {
    %c128_i32 = arith.constant 128 : i32
    %0 = arith.muli %arg1, %c128_i32 : i32
    %1 = tpu.assume_multiple %0, 8 : i32
    %c0_i32 = arith.constant 0 : i32
    %2 = arith.cmpi eq, %arg0, %c0_i32 : i32
    %3 = arith.extui %2 : i1 to i32
    %c0_i32_0 = arith.constant 0 : i32
    %4 = arith.cmpi ne, %3, %c0_i32_0 : i32
    scf.if %4 {
      %c0_i32_3 = arith.constant 0 : i32
      %11 = arith.cmpi eq, %arg1, %c0_i32_3 : i32
      %12 = arith.extui %11 : i1 to i32
      %c0_i32_4 = arith.constant 0 : i32
      %13 = arith.cmpi ne, %12, %c0_i32_4 : i32
      scf.if %13 {
        %cst_16 = arith.constant 0.000000e+00 : f32
        %27 = vector.broadcast %cst_16 : f32 to vector<1x8xf32>
        %c0_17 = arith.constant 0 : index
        %c0_18 = arith.constant 0 : index
        %28 = vector.load %arg9[%c0_17, %c0_18] : memref<1x8xf32, #tpu.memory_space<vmem>>, vector<1x8xf32>
        tpu.vector_store %arg9[%c0_17, %c0_18], %27 {strides = array<i32>} : memref<1x8xf32, #tpu.memory_space<vmem>>, vector<1x8xf32>,
        %cst_19 = arith.constant 0.000000e+00 : f32
        %29 = vector.broadcast %cst_19 : f32 to vector<1x8xf32>
        %c0_20 = arith.constant 0 : index
        %c0_21 = arith.constant 0 : index
        %30 = vector.load %arg10[%c0_20, %c0_21] : memref<1x8xf32, #tpu.memory_space<vmem>>, vector<1x8xf32>
        tpu.vector_store %arg10[%c0_20, %c0_21], %29 {strides = array<i32>} : memref<1x8xf32, #tpu.memory_space<vmem>>, vector<1x8xf32>,
      } else {
      }
      %c0 = arith.constant 0 : index
      %c0_5 = arith.constant 0 : index
      %14 = vector.load %arg2[%c0, %c0_5] : memref<128x16xbf16, #tpu.memory_space<vmem>>, vector<128x16xbf16>
      %c0_6 = arith.constant 0 : index
      %c0_7 = arith.constant 0 : index
      %15 = vector.load %arg3[%c0_6, %c0_7] : memref<16x8xbf16, #tpu.memory_space<vmem>>, vector<16x8xbf16>
      %cst = arith.constant dense<0.000000e+00> : vector<128x8xf32>
      %16 = tpu.matmul %14, %15, %cst {dimension_numbers = #tpu.dot_dimension_numbers<[1], [0], [0], [1], [0, 0, 1, 1], [], []>} : vector<128x16xbf16>, vector<16x8xbf16>, vector<128x8xf32> -> vector<128x8xf32>
      %17 = arith.index_cast %1 : i32 to index
      %c0_8 = arith.constant 0 : index
      %18 = vector.load %arg8[%17, %c0_8] : memref<128x8xf32, #tpu.memory_space<vmem>>, vector<128x8xf32>
      tpu.vector_store %arg8[%17, %c0_8], %16 {strides = array<i32>} : memref<128x8xf32, #tpu.memory_space<vmem>>, vector<128x8xf32>,
      %c0_9 = arith.constant 0 : index
      %c0_10 = arith.constant 0 : index
      %19 = vector.load %arg9[%c0_9, %c0_10] : memref<1x8xf32, #tpu.memory_space<vmem>>, vector<1x8xf32>
      %cst_11 = arith.constant dense<0.000000e+00> : vector<8xf32>
      %20 = vector.multi_reduction <add>, %16, %cst_11 [0] : vector<128x8xf32> to vector<8xf32>
      %21 = vector.shape_cast %20 : vector<8xf32> to vector<1x8xf32>
      %22 = arith.addf %19, %21 : vector<1x8xf32>
      %c0_12 = arith.constant 0 : index
      %c0_13 = arith.constant 0 : index
      %23 = vector.load %arg9[%c0_12, %c0_13] : memref<1x8xf32, #tpu.memory_space<vmem>>, vector<1x8xf32>
      tpu.vector_store %arg9[%c0_12, %c0_13], %22 {strides = array<i32>} : memref<1x8xf32, #tpu.memory_space<vmem>>, vector<1x8xf32>,
      %c0_i32_14 = arith.constant 0 : i32
      %24 = arith.cmpi eq, %arg1, %c0_i32_14 : i32
      %25 = arith.extui %24 : i1 to i32
      %c0_i32_15 = arith.constant 0 : i32
      %26 = arith.cmpi ne, %25, %c0_i32_15 : i32
      scf.if %26 {
        %c0_16 = arith.constant 0 : index
        %c0_17 = arith.constant 0 : index
        %27 = vector.load %arg9[%c0_16, %c0_17] : memref<1x8xf32, #tpu.memory_space<vmem>>, vector<1x8xf32>
        %cst_18 = arith.constant 7.812500e-03 : f32
        %28 = vector.broadcast %cst_18 : f32 to vector<1x8xf32>
        %29 = arith.mulf %27, %28 : vector<1x8xf32>
        %c0_19 = arith.constant 0 : index
        %c0_20 = arith.constant 0 : index
        %30 = vector.load %arg9[%c0_19, %c0_20] : memref<1x8xf32, #tpu.memory_space<vmem>>, vector<1x8xf32>
        tpu.vector_store %arg9[%c0_19, %c0_20], %29 {strides = array<i32>} : memref<1x8xf32, #tpu.memory_space<vmem>>, vector<1x8xf32>,
      } else {
      }
    } else {
    }
    %c1_i32 = arith.constant 1 : i32
    %5 = arith.cmpi eq, %arg0, %c1_i32 : i32
    %6 = arith.extui %5 : i1 to i32
    %c0_i32_1 = arith.constant 0 : i32
    %7 = arith.cmpi ne, %6, %c0_i32_1 : i32
    scf.if %7 {
      %11 = arith.index_cast %1 : i32 to index
      %c0 = arith.constant 0 : index
      %12 = vector.load %arg8[%11, %c0] : memref<128x8xf32, #tpu.memory_space<vmem>>, vector<128x8xf32>
      %c0_3 = arith.constant 0 : index
      %c0_4 = arith.constant 0 : index
      %13 = vector.load %arg9[%c0_3, %c0_4] : memref<1x8xf32, #tpu.memory_space<vmem>>, vector<1x8xf32>
      %14 = vector.broadcast %13 : vector<1x8xf32> to vector<128x8xf32>
      %15 = arith.subf %12, %14 : vector<128x8xf32>
      %c0_5 = arith.constant 0 : index
      %c0_6 = arith.constant 0 : index
      %16 = vector.load %arg10[%c0_5, %c0_6] : memref<1x8xf32, #tpu.memory_space<vmem>>, vector<1x8xf32>
      %17 = arith.mulf %15, %15 : vector<128x8xf32>
      %cst = arith.constant dense<0.000000e+00> : vector<8xf32>
      %18 = vector.multi_reduction <add>, %17, %cst [0] : vector<128x8xf32> to vector<8xf32>
      %19 = vector.shape_cast %18 : vector<8xf32> to vector<1x8xf32>
      %20 = arith.addf %16, %19 : vector<1x8xf32>
      %c0_7 = arith.constant 0 : index
      %c0_8 = arith.constant 0 : index
      %21 = vector.load %arg10[%c0_7, %c0_8] : memref<1x8xf32, #tpu.memory_space<vmem>>, vector<1x8xf32>
      tpu.vector_store %arg10[%c0_7, %c0_8], %20 {strides = array<i32>} : memref<1x8xf32, #tpu.memory_space<vmem>>, vector<1x8xf32>,
      %c0_i32_9 = arith.constant 0 : i32
      %22 = arith.cmpi eq, %arg1, %c0_i32_9 : i32
      %23 = arith.extui %22 : i1 to i32
      %c0_i32_10 = arith.constant 0 : i32
      %24 = arith.cmpi ne, %23, %c0_i32_10 : i32
      scf.if %24 {
        %c0_11 = arith.constant 0 : index
        %c0_12 = arith.constant 0 : index
        %25 = vector.load %arg10[%c0_11, %c0_12] : memref<1x8xf32, #tpu.memory_space<vmem>>, vector<1x8xf32>
        %cst_13 = arith.constant 7.812500e-03 : f32
        %26 = vector.broadcast %cst_13 : f32 to vector<1x8xf32>
        %27 = arith.mulf %25, %26 : vector<1x8xf32>
        %cst_14 = arith.constant 9.99999974E-6 : f32
        %28 = vector.broadcast %cst_14 : f32 to vector<1x8xf32>
        %29 = arith.addf %27, %28 : vector<1x8xf32>
        %30 = math.rsqrt %29 : vector<1x8xf32>
        %c0_15 = arith.constant 0 : index
        %c0_16 = arith.constant 0 : index
        %31 = vector.load %arg10[%c0_15, %c0_16] : memref<1x8xf32, #tpu.memory_space<vmem>>, vector<1x8xf32>
        tpu.vector_store %arg10[%c0_15, %c0_16], %30 {strides = array<i32>} : memref<1x8xf32, #tpu.memory_space<vmem>>, vector<1x8xf32>,
      } else {
      }
    } else {
    }
    %c2_i32 = arith.constant 2 : i32
    %8 = arith.cmpi eq, %arg0, %c2_i32 : i32
    %9 = arith.extui %8 : i1 to i32
    %c0_i32_2 = arith.constant 0 : i32
    %10 = arith.cmpi ne, %9, %c0_i32_2 : i32
    scf.if %10 {
      %11 = arith.index_cast %1 : i32 to index
      %c0 = arith.constant 0 : index
      %12 = vector.load %arg8[%11, %c0] : memref<128x8xf32, #tpu.memory_space<vmem>>, vector<128x8xf32>
      %c0_3 = arith.constant 0 : index
      %c0_4 = arith.constant 0 : index
      %13 = vector.load %arg9[%c0_3, %c0_4] : memref<1x8xf32, #tpu.memory_space<vmem>>, vector<1x8xf32>
      %14 = vector.broadcast %13 : vector<1x8xf32> to vector<128x8xf32>
      %15 = arith.subf %12, %14 : vector<128x8xf32>
      %c0_5 = arith.constant 0 : index
      %c0_6 = arith.constant 0 : index
      %16 = vector.load %arg10[%c0_5, %c0_6] : memref<1x8xf32, #tpu.memory_space<vmem>>, vector<1x8xf32>
      %c0_7 = arith.constant 0 : index
      %c0_8 = arith.constant 0 : index
      %17 = vector.load %arg5[%c0_7, %c0_8] : memref<1x8xf32, #tpu.memory_space<vmem>>, vector<1x8xf32>
      %18 = arith.mulf %16, %17 : vector<1x8xf32>
      %19 = vector.broadcast %18 : vector<1x8xf32> to vector<128x8xf32>
      %20 = arith.mulf %15, %19 : vector<128x8xf32>
      %c0_9 = arith.constant 0 : index
      %c0_10 = arith.constant 0 : index
      %21 = vector.load %arg6[%c0_9, %c0_10] : memref<1x8xf32, #tpu.memory_space<vmem>>, vector<1x8xf32>
      %22 = vector.broadcast %21 : vector<1x8xf32> to vector<128x8xf32>
      %23 = arith.addf %20, %22 : vector<128x8xf32>
      %cst = arith.constant 0.000000e+00 : f32
      %24 = vector.broadcast %cst : f32 to vector<128x8xf32>
      %25 = arith.maximumf %23, %24 : vector<128x8xf32>
      %26 = arith.truncf %25 : vector<128x8xf32> to vector<128x8xbf16>
      %c0_11 = arith.constant 0 : index
      %c0_12 = arith.constant 0 : index
      %27 = vector.load %arg4[%c0_11, %c0_12] : memref<8x32xbf16, #tpu.memory_space<vmem>>, vector<8x32xbf16>
      %cst_13 = arith.constant dense<0.000000e+00> : vector<128x32xf32>
      %28 = tpu.matmul %26, %27, %cst_13 {dimension_numbers = #tpu.dot_dimension_numbers<[1], [0], [0], [1], [0, 0, 1, 1], [], []>} : vector<128x8xbf16>, vector<8x32xbf16>, vector<128x32xf32> -> vector<128x32xf32>
      %29 = arith.truncf %28 : vector<128x32xf32> to vector<128x32xbf16>
      %c0_14 = arith.constant 0 : index
      %c0_15 = arith.constant 0 : index
      %30 = vector.load %arg7[%c0_14, %c0_15] : memref<128x32xbf16, #tpu.memory_space<vmem>>, vector<128x32xbf16>
      tpu.vector_store %arg7[%c0_14, %c0_15], %29 {strides = array<i32>} : memref<128x32xbf16, #tpu.memory_space<vmem>>, vector<128x32xbf16>,
    } else {
    }
    return
  }
  func.func @transform_0(%arg0: i32, %arg1: i32) -> (i32, i32) {
    %c0_i32 = arith.constant 0 : i32
    %0 = arith.cmpi eq, %arg0, %c0_i32 : i32
    %c0_i32_0 = arith.constant 0 : i32
    %1 = arith.select %0, %arg1, %c0_i32_0 : i32
    %c0_i32_1 = arith.constant 0 : i32
    %c0_i32_2 = arith.constant 0 : i32
    return %1, %c0_i32_1 : i32, i32
  }
  func.func @transform_1(%arg0: i32, %arg1: i32) -> (i32, i32) {
    %c0_i32 = arith.constant 0 : i32
    %c0_i32_0 = arith.constant 0 : i32
    %c0_i32_1 = arith.constant 0 : i32
    return %c0_i32, %c0_i32_0 : i32, i32
  }
  func.func @transform_2(%arg0: i32, %arg1: i32) -> (i32, i32) {
    %c0_i32 = arith.constant 0 : i32
    %c0_i32_0 = arith.constant 0 : i32
    %c0_i32_1 = arith.constant 0 : i32
    return %c0_i32, %c0_i32_0 : i32, i32
  }
  func.func @transform_3(%arg0: i32, %arg1: i32) -> (i32, i32) {
    %c0_i32 = arith.constant 0 : i32
    %c0_i32_0 = arith.constant 0 : i32
    %c0_i32_1 = arith.constant 0 : i32
    return %c0_i32, %c0_i32_0 : i32, i32
  }
  func.func @transform_4(%arg0: i32, %arg1: i32) -> (i32, i32) {
    %c0_i32 = arith.constant 0 : i32
    %c0_i32_0 = arith.constant 0 : i32
    %c0_i32_1 = arith.constant 0 : i32
    return %c0_i32, %c0_i32_0 : i32, i32
  }
  func.func @transform_5(%arg0: i32, %arg1: i32) -> (i32, i32) {
    %c2_i32 = arith.constant 2 : i32
    %0 = arith.cmpi eq, %arg0, %c2_i32 : i32
    %c0_i32 = arith.constant 0 : i32
    %1 = arith.select %0, %arg1, %c0_i32 : i32
    %c0_i32_0 = arith.constant 0 : i32
    %c0_i32_1 = arith.constant 0 : i32
    return %1, %c0_i32_0 : i32, i32
  }
}

</mosaic_0001>

<bundles_post_ra>
// kernel: tpu_custom_call.1
= control target key start
LH: loop header
LB: loop body
LE: loop exit
PB: predicated region body
PF: predicated region fallthrough
CT: control target
= control target key end

     0   :  { %s1264_s18 = smov 0   ;;  %s1266_s19 = smov 0   ;;  %s1482_s0 = inlined_call_operand.vmem [shape: bf16[128,16], index: 0, kind: input, shape index: {}]   ;;  %s1483_s1 = inlined_call_operand.vmem [shape: bf16[16,8], index: 1, kind: input, shape index: {}]   ;;  %s1484_s2 = inlined_call_operand.vmem [shape: bf16[8,32], index: 2, kind: input, shape index: {}]   ;;  %s1485_s3 = inlined_call_operand.vmem [shape: f32[1,8], index: 3, kind: input, shape index: {}]   ;;  %s1486_s4 = inlined_call_operand.vmem [shape: f32[1,8], index: 4, kind: input, shape index: {}]   ;;  %s1487_s5 = inlined_call_operand.vmem [shape: bf16[128,32], index: 5, kind: output, shape index: {}]  }
   0x1   :  { %s1268_s20 = smov 0  }
   0x2 LB: > { %s27_s21 = sadd.s32 1, %s1227_s19  ;;  %p1045_p0 = scmp.ge.s32.totalorder %s1231_s20, 1  ;;  %s1231_s20 = sphi %s1268_s20, %s15_s20   ;;  %s1227_s19 = sphi %s1266_s19, %s1489_s19   ;;  %s1223_s18 = sphi %s1264_s18, %s1488_s18  }
   0x3   : > { %p29_p1 = scmp.ge.s32.totalorder %s27_s21, 3  ;;  %p212_p2 = scmp.lt.s32.totalorder %s1231_s20, 4 }
   0x5   : > { %s1491_s21 = smov (%p29_p1, %s27_s21), 0  ;;  %p213_p3 = pnand %p1045_p0, %p212_p2 }
   0x6   : > { %p1046_p4 = scmp.ne.s32.totalorder (!%p213_p3), %s1223_s18, 0 }
   0x7   : > { %216 = sbr.rel (%p213_p3) target bundleno = 618 (0x26a), region = 40 }
   0xe   : > { %269 = sbr.rel (%p1046_p4) target bundleno = 290 (0x122), region = 44  ;;  %v1198_v0 = vld [vmem:[%s1483_s1] sm:$0xff] (!%p1046_p4)   ;;  %vm341_vm0 = vcmask (!%p1046_p4), 130048   ;;  %v1200_v2 = vld [vmem:[%s1482_s0 + $0x8] sm:$0xff] (!%p1046_p4)   ;;  %v1201_v3 = vld [vmem:[%s1482_s0 + $0x10] sm:$0xff] (!%p1046_p4)   ;;  %vm274_vm1 = vcmask (!%p1046_p4), 57344  }
   0xf   : > { %v1199_v1 = vld [vmem:[%s1482_s0] sm:$0xff] (!%p1046_p4)   ;;  %1131 = vmatprep.subr.bf16.mxu0 (!%p1046_p4), %v1198_v0  ;;  %1167 = vmatprep.subr.bf16.mxu1 (!%p1046_p4), %v1198_v0  ;;  %v1204_v5 = vld [vmem:[%s1482_s0 + $0x28] sm:$0xff] (!%p1046_p4)   ;;  %v1205_v6 = vld [vmem:[%s1482_s0 + $0x30] sm:$0xff] (!%p1046_p4)   ;;  %v1233_v9 = vmov (!%p1046_p4), 0.0   ;;  %vm464_vm2 = vcmask (!%p1046_p4), 64512  }
  0x10   : > { %1132 = vmatpush3.bf16.msra.mxu0 (!%p1046_p4), %v1198_v0  ;;  %1133 = vmatprep.mubr.msk.bf16.mxu0 (!%p1046_p4), %vm341_vm0, %v1199_v1  ;;  %v1203_v4 = vld [vmem:[%s1482_s0 + $0x20] sm:$0xff] (!%p1046_p4)   ;;  %v1202_v7 = vld [vmem:[%s1482_s0 + $0x18] sm:$0xff] (!%p1046_p4)   ;;  %275 = vst.msk [vmem:[#allocation3] sm:$0x1] (!%p1046_p4), %vm274_vm1, %v1233_v9  ;;  %276 = vst.msk [vmem:[#allocation4] sm:$0x1] (!%p1046_p4), %vm274_vm1, %v1233_v9 }
  0x11   : > { %1168 = vmatpush3.bf16.msra.mxu1 (!%p1046_p4), %v1198_v0  ;;  %1141 = vmatprep.mubr.msk.bf16.mxu1 (!%p1046_p4), %vm341_vm0, %v1203_v4  ;;  %v1206_v8 = vld [vmem:[%s1482_s0 + $0x38] sm:$0xff] (!%p1046_p4)  }
  0x13   : > { %1134 = vmatmul.mubr.msk.bf16.vlgmr.msra.gmra.mrb[0].mxu0 (!%p1046_p4), %vm341_vm0, %v1200_v2 }
  0x14   : > { %1137 = vmatprep.mubr.msk.bf16.mxu0 (!%p1046_p4), %vm341_vm0, %v1201_v3  ;;  %1142 = vmatmul.mubr.msk.bf16.vlgmr.msra.gmra.mrb[0].mxu1 (!%p1046_p4), %vm341_vm0, %v1204_v5 }
  0x15   : > { %1145 = vmatprep.mubr.msk.bf16.mxu1 %vm341_vm0, %v1205_v6 }
  0x17   : > { %v481_v62 = vld [vmem:[#allocation3] sm:$0x1] }
  0x1b   : > { %1138 = vmatmul.mubr.msk.bf16.gmra.mrb[4].mxu0 %vm341_vm0, %v1202_v7 }
  0x1c   : > { %1146 = vmatmul.mubr.msk.bf16.gmra.mrb[4].mxu1 %vm341_vm0, %v1206_v8 }
  0xe6   : > { %v1135_v10 = vpop.f32.mrb[0].mxu0 }
  0xe7   : > { %467 = vst.msk [vmem:[#allocation2 + $0x10] sm:$0xff] %vm464_vm2, %v1135_v10  ;;  %v400_v11 = vpop.f32.mrb[1].mxu0  ;;  %v1143_v13 = vpop.f32.mrb[0].mxu1  ;;  %v485_v21 = vsel %vm464_vm2, %v1135_v10, 0.0 }
  0xe8   : > { %465 = vst.msk [vmem:[#allocation2] sm:$0xff] %vm464_vm2, %v400_v11  ;;  %v1136_v12 = vpop.f32.mrb[2].mxu0  ;;  %475 = vst.msk [vmem:[#allocation2 + $0x50] sm:$0xff] %vm464_vm2, %v1143_v13  ;;  %v432_v15 = vpop.f32.mrb[1].mxu1  ;;  %v482_v16 = vsel %vm464_vm2, %v400_v11, 0.0  ;;  %v501_v45 = vsel %vm464_vm2, %v1143_v13, 0.0 }
  0xe9   : > { %468 = vst.msk [vmem:[#allocation2 + $0x18] sm:$0xff] %vm464_vm2, %v1136_v12  ;;  %v403_v14 = vpop.f32.mrb[3].mxu0  ;;  %473 = vst.msk [vmem:[#allocation2 + $0x40] sm:$0xff] %vm464_vm2, %v432_v15  ;;  %v1144_v18 = vpop.f32.mrb[2].mxu1  ;;  %v487_v23 = vsel %vm464_vm2, %v1136_v12, 0.0  ;;  %v497_v40 = vsel %vm464_vm2, %v432_v15, 0.0 }
  0xea   : > { %466 = vst.msk [vmem:[#allocation2 + $0x8] sm:$0xff] %vm464_vm2, %v403_v14  ;;  %v483_v17 = vsel %vm464_vm2, %v403_v14, 0.0  ;;  %476 = vst.msk [vmem:[#allocation2 + $0x58] sm:$0xff] %vm464_vm2, %v1144_v18  ;;  %v435_v20 = vpop.f32.mrb[3].mxu1  ;;  %v503_v47 = vsel %vm464_vm2, %v1144_v18, 0.0 }
  0xeb   : > { %v484_v19 = vadd.f32 %v483_v17, %v482_v16  ;;  %474 = vst.msk [vmem:[#allocation2 + $0x48] sm:$0xff] %vm464_vm2, %v435_v20  ;;  %v499_v43 = vsel %vm464_vm2, %v435_v20, 0.0 }
  0xed   : > { %v486_v22 = vadd.f32 %v485_v21, %v484_v19 }
  0xee   : > { %v1139_v24 = vpop.f32.mrb[4].mxu0 }
  0xef   : > { %471 = vst.msk [vmem:[#allocation2 + $0x30] sm:$0xff] %vm464_vm2, %v1139_v24  ;;  %v416_v25 = vpop.f32.mrb[5].mxu0  ;;  %v488_v26 = vadd.f32 %v487_v23, %v486_v22  ;;  %v1147_v29 = vpop.f32.mrb[4].mxu1  ;;  %v493_v37 = vsel %vm464_vm2, %v1139_v24, 0.0 }
  0xf0   : > { %469 = vst.msk [vmem:[#allocation2 + $0x20] sm:$0xff] %vm464_vm2, %v416_v25  ;;  %v489_v27 = vsel %vm464_vm2, %v416_v25, 0.0  ;;  %v1140_v28 = vpop.f32.mrb[6].mxu0  ;;  %479 = vst.msk [vmem:[#allocation2 + $0x70] sm:$0xff] %vm464_vm2, %v1147_v29  ;;  %v448_v32 = vpop.f32.mrb[5].mxu1  ;;  %v509_v53 = vsel %vm464_vm2, %v1147_v29, 0.0 }
  0xf1   : > { %v490_v30 = vadd.f32 %v489_v27, %v488_v26  ;;  %472 = vst.msk [vmem:[#allocation2 + $0x38] sm:$0xff] %vm464_vm2, %v1140_v28  ;;  %v419_v31 = vpop.f32.mrb[7].mxu0  ;;  %477 = vst.msk [vmem:[#allocation2 + $0x60] sm:$0xff] %vm464_vm2, %v448_v32  ;;  %v1148_v34 = vpop.f32.mrb[6].mxu1  ;;  %v495_v39 = vsel %vm464_vm2, %v1140_v28, 0.0  ;;  %v505_v48 = vsel %vm464_vm2, %v448_v32, 0.0 }
  0xf2   : > { %470 = vst.msk [vmem:[#allocation2 + $0x28] sm:$0xff] %vm464_vm2, %v419_v31  ;;  %v491_v33 = vsel %vm464_vm2, %v419_v31, 0.0  ;;  %480 = vst.msk [vmem:[#allocation2 + $0x78] sm:$0xff] %vm464_vm2, %v1148_v34  ;;  %v451_v36 = vpop.f32.mrb[7].mxu1  ;;  %v511_v55 = vsel %vm464_vm2, %v1148_v34, 0.0 }
  0xf3   : > { %v492_v35 = vadd.f32 %v491_v33, %v490_v30  ;;  %478 = vst.msk [vmem:[#allocation2 + $0x68] sm:$0xff] %vm464_vm2, %v451_v36  ;;  %v507_v51 = vsel %vm464_vm2, %v451_v36, 0.0 }
  0xf5   : > { %v494_v38 = vadd.f32 %v493_v37, %v492_v35 }
  0xf7   : > { %v496_v41 = vadd.f32 %v495_v39, %v494_v38 }
  0xf9   : > { %v498_v42 = vadd.f32 %v497_v40, %v496_v41 }
  0xfb   : > { %v500_v44 = vadd.f32 %v499_v43, %v498_v42 }
  0xfd   : > { %v502_v46 = vadd.f32 %v501_v45, %v500_v44 }
  0xff   : > { %v504_v49 = vadd.f32 %v503_v47, %v502_v46 }
 0x101   : > { %v506_v50 = vadd.f32 %v505_v48, %v504_v49 }
 0x103   : > { %v508_v52 = vadd.f32 %v507_v51, %v506_v50 }
 0x105   : > { %v510_v54 = vadd.f32 %v509_v53, %v508_v52 }
 0x107   : > { %v512_v56 = vadd.f32 %v511_v55, %v510_v54 }
 0x109   : > { %v513_v57 = vrot.slane %v512_v56, 4 }
 0x10b   : > { %v514_v58 = vadd.f32 %v513_v57, %v512_v56 }
 0x10d   : > { %v515_v59 = vrot.slane %v514_v58, 2 }
 0x10f   : > { %v516_v60 = vadd.f32 %v515_v59, %v514_v58 }
 0x111   : > { %v517_v61 = vrot.slane %v516_v60, 1 }
 0x113   : > { %v518_v63 = vadd.f32 %v517_v61, %v516_v60 }
 0x115   : > { %v519_v0 = vadd.f32 %v518_v63, %v481_v62 }
 0x117   : > { %521 = vst.msk [vmem:[#allocation3] sm:$0x1] %vm274_vm1, %v519_v0 }
 0x11e   : > { %v525_v1 = vld [vmem:[#allocation3] sm:$0x1] }
 0x11f   : > { %v526_v2 = vmul.f32 0.0078125, %v525_v1 }
 0x121   : > { %527 = vst.msk [vmem:[#allocation3] sm:$0x1] %vm274_vm1, %v526_v2 }
 0x122 PF: > { %p1064_p5 = scmp.ne.s32.totalorder %s1223_s18, 1 }
 0x123   : > { %v533_v3 = vld [vmem:[#allocation2] sm:$0xff] (!%p1064_p5)  ;;  %v534_v4 = vld [vmem:[#allocation2 + $0x8] sm:$0xff] (!%p1064_p5)  ;;  %v535_v5 = vld [vmem:[#allocation2 + $0x10] sm:$0xff] (!%p1064_p5)  ;;  %vm589_vm3 = vcmask (!%p1064_p5), 64512   ;;  %vm628_vm4 = vcmask (!%p1064_p5), 57344  }
 0x124   : > { %531 = sbr.rel (%p1064_p5) target bundleno = 370 (0x172), region = 56  ;;  %v536_v6 = vld [vmem:[#allocation2 + $0x18] sm:$0xff] (!%p1064_p5)  ;;  %v537_v11 = vld [vmem:[#allocation2 + $0x20] sm:$0xff] (!%p1064_p5)  ;;  %v538_v13 = vld [vmem:[#allocation2 + $0x28] sm:$0xff] (!%p1064_p5) }
 0x125   : > { %v539_v14 = vld [vmem:[#allocation2 + $0x30] sm:$0xff] (!%p1064_p5)  ;;  %v540_v21 = vld [vmem:[#allocation2 + $0x38] sm:$0xff] (!%p1064_p5)  ;;  %v541_v27 = vld [vmem:[#allocation2 + $0x40] sm:$0xff] (!%p1064_p5) }
 0x126   : > { %v542_v32 = vld [vmem:[#allocation2 + $0x48] sm:$0xff] (!%p1064_p5)  ;;  %v543_v37 = vld [vmem:[#allocation2 + $0x50] sm:$0xff] (!%p1064_p5)  ;;  %v544_v42 = vld [vmem:[#allocation2 + $0x58] sm:$0xff] (!%p1064_p5) }
 0x127   : > { %v545_v47 = vld [vmem:[#allocation2 + $0x60] sm:$0xff] (!%p1064_p5)  ;;  %v546_v52 = vld [vmem:[#allocation2 + $0x68] sm:$0xff] (!%p1064_p5)  ;;  %v547_v57 = vld [vmem:[#allocation2 + $0x70] sm:$0xff] (!%p1064_p5) }
 0x128   : > { %v1065_v7 = vld [vmem:[#allocation3] ss:$0 sm:$0xff] (!%p1064_p5)  ;;  %v548_v62 = vld [vmem:[#allocation2 + $0x78] sm:$0xff] (!%p1064_p5) }
 0x129   : > { %v556_v8 = vsub.f32 (!%p1064_p5), %v533_v3, %v1065_v7  ;;  %v557_v9 = vsub.f32 (!%p1064_p5), %v534_v4, %v1065_v7  ;;  %v558_v10 = vsub.f32 (!%p1064_p5), %v535_v5, %v1065_v7  ;;  %v559_v12 = vsub.f32 (!%p1064_p5), %v536_v6, %v1065_v7 }
 0x12a   : > { %v560_v15 = vsub.f32 (!%p1064_p5), %v537_v11, %v1065_v7  ;;  %v561_v19 = vsub.f32 (!%p1064_p5), %v538_v13, %v1065_v7  ;;  %v562_v22 = vsub.f32 (!%p1064_p5), %v539_v14, %v1065_v7  ;;  %v563_v29 = vsub.f32 (!%p1064_p5), %v540_v21, %v1065_v7 }
 0x12b   : > { %v573_v16 = vmul.f32 %v556_v8, %v556_v8  ;;  %v574_v17 = vmul.f32 %v557_v9, %v557_v9  ;;  %v575_v18 = vmul.f32 %v558_v10, %v558_v10  ;;  %v576_v20 = vmul.f32 %v559_v12, %v559_v12 }
 0x12c   : > { %v577_v23 = vmul.f32 %v560_v15, %v560_v15  ;;  %v578_v30 = vmul.f32 %v561_v19, %v561_v19  ;;  %v564_v34 = vsub.f32 %v541_v27, %v1065_v7  ;;  %v579_v35 = vmul.f32 %v562_v22, %v562_v22 }
 0x12d   : > { %v590_v24 = vsel %vm589_vm3, %v573_v16, 0.0  ;;  %v591_v25 = vsel %vm589_vm3, %v574_v17, 0.0  ;;  %v593_v26 = vsel %vm589_vm3, %v575_v18, 0.0  ;;  %v595_v31 = vsel %vm589_vm3, %v576_v20, 0.0 }
 0x12e   : > { %v592_v28 = vadd.f32 %v591_v25, %v590_v24  ;;  %v597_v36 = vsel %vm589_vm3, %v577_v23, 0.0  ;;  %v565_v39 = vsub.f32 %v542_v32, %v1065_v7  ;;  %v580_v40 = vmul.f32 %v563_v29, %v563_v29  ;;  %v572_v24 = vld [vmem:[#allocation4] sm:$0x1] }
 0x12f   : > { %v599_v41 = vsel %vm589_vm3, %v578_v30, 0.0  ;;  %v566_v44 = vsub.f32 %v543_v37, %v1065_v7  ;;  %v581_v45 = vmul.f32 %v564_v34, %v564_v34  ;;  %v601_v46 = vsel %vm589_vm3, %v579_v35, 0.0 }
 0x130   : > { %v594_v33 = vadd.f32 %v593_v26, %v592_v28  ;;  %v567_v49 = vsub.f32 %v544_v42, %v1065_v7  ;;  %v582_v50 = vmul.f32 %v565_v39, %v565_v39  ;;  %v603_v51 = vsel %vm589_vm3, %v580_v40, 0.0 }
 0x131   : > { %v568_v54 = vsub.f32 %v545_v47, %v1065_v7  ;;  %v583_v55 = vmul.f32 %v566_v44, %v566_v44  ;;  %v605_v56 = vsel %vm589_vm3, %v581_v45, 0.0  ;;  %v569_v59 = vsub.f32 %v546_v52, %v1065_v7 }
 0x132   : > { %v596_v38 = vadd.f32 %v595_v31, %v594_v33  ;;  %v584_v60 = vmul.f32 %v567_v49, %v567_v49  ;;  %v607_v61 = vsel %vm589_vm3, %v582_v50, 0.0  ;;  %v570_v0 = vsub.f32 %v547_v57, %v1065_v7 }
 0x133   : > { %v585_v1 = vmul.f32 %v568_v54, %v568_v54  ;;  %v609_v2 = vsel %vm589_vm3, %v583_v55, 0.0  ;;  %v571_v4 = vsub.f32 %v548_v62, %v1065_v7  ;;  %v586_v5 = vmul.f32 %v569_v59, %v569_v59 }
 0x134   : > { %v598_v43 = vadd.f32 %v597_v36, %v596_v38  ;;  %v611_v6 = vsel %vm589_vm3, %v584_v60, 0.0  ;;  %v587_v9 = vmul.f32 %v570_v0, %v570_v0 }
 0x135   : > { %v613_v10 = vsel %vm589_vm3, %v585_v1, 0.0  ;;  %v588_v12 = vmul.f32 %v571_v4, %v571_v4  ;;  %v615_v13 = vsel %vm589_vm3, %v586_v5, 0.0 }
 0x136   : > { %v600_v48 = vadd.f32 %v599_v41, %v598_v43  ;;  %v617_v15 = vsel %vm589_vm3, %v587_v9, 0.0 }
 0x137   : > { %v619_v17 = vsel %vm589_vm3, %v588_v12, 0.0 }
 0x138   : > { %v602_v53 = vadd.f32 %v601_v46, %v600_v48 }
 0x13a   : > { %v604_v58 = vadd.f32 %v603_v51, %v602_v53 }
 0x13c   : > { %v606_v63 = vadd.f32 %v605_v56, %v604_v58 }
 0x13e   : > { %v608_v3 = vadd.f32 %v607_v61, %v606_v63 }
 0x140   : > { %v610_v8 = vadd.f32 %v609_v2, %v608_v3 }
 0x142   : > { %v612_v11 = vadd.f32 %v611_v6, %v610_v8 }
 0x144   : > { %v614_v14 = vadd.f32 %v613_v10, %v612_v11 }
 0x146   : > { %v616_v16 = vadd.f32 %v615_v13, %v614_v14 }
 0x148   : > { %v618_v18 = vadd.f32 %v617_v15, %v616_v16 }
 0x14a   : > { %v620_v19 = vadd.f32 %v619_v17, %v618_v18 }
 0x14c   : > { %v621_v7 = vrot.slane %v620_v19, 4 }
 0x14e   : > { %v622_v20 = vadd.f32 %v621_v7, %v620_v19 }
 0x150   : > { %v623_v21 = vrot.slane %v622_v20, 2 }
 0x152   : > { %v624_v22 = vadd.f32 %v623_v21, %v622_v20 }
 0x154   : > { %v625_v23 = vrot.slane %v624_v22, 1 }
 0x156   : > { %v626_v25 = vadd.f32 %v625_v23, %v624_v22 }
 0x158   : > { %v627_v26 = vadd.f32 %v626_v25, %v572_v24 }
 0x15a   : > { %629 = vst.msk [vmem:[#allocation4] sm:$0x1] %vm628_vm4, %v627_v26 }
 0x161   : > { %v634_v27 = vld [vmem:[#allocation4] sm:$0x1] }
 0x162   : > { %v635_v28 = vmul.f32 0.0078125, %v634_v27 }
 0x164   : > { %v636_v29 = vadd.f32 1e-05, %v635_v28 }
 0x166   : > { %1207 = vrsqrt.f32 %v636_v29 }
 0x170   : > { %v1208_v30 = vpop.eup %1207 }
 0x171   : > { %638 = vst.msk [vmem:[#allocation4] sm:$0x1] %vm628_vm4, %v1208_v30 }
 0x172 PF: > { %p1066_p6 = scmp.ne.s32.totalorder %s1223_s18, 2 }
 0x173   : > { %v755_v31 = vld [vmem:[%s1484_s2] sm:$0xf] (!%p1066_p6)  ;;  %vm781_vm5 = vcmask (!%p1066_p6), 1043456   ;;  %v645_v33 = vld [vmem:[#allocation2 + $0x8] sm:$0xff] (!%p1066_p6)  ;;  %v687_v34 = vlaneseq (!%p1066_p6)  ;;  %v646_v45 = vld [vmem:[#allocation2 + $0x10] sm:$0xff] (!%p1066_p6)  ;;  %vm756_vm6 = vcmask (!%p1066_p6), 64512  }
 0x174   : > { %642 = sbr.rel (%p1066_p6) target bundleno = 618 (0x26a), region = 64  ;;  %v644_v32 = vld [vmem:[#allocation2] sm:$0xff] (!%p1066_p6)  ;;  %1171 = vmatprep.subr.msk.bf16.mxu0 (!%p1066_p6), %vm781_vm5, %v755_v31  ;;  %1172 = vmatprep.subr.msk.bf16.mxu1 (!%p1066_p6), %vm781_vm5, %v755_v31  ;;  %v783_v35 = vsel (!%p1066_p6), %vm781_vm5, %v755_v31, 0  ;;  %v653_v41 = vld [vmem:[#allocation2 + $0x48] sm:$0xff] (!%p1066_p6)  ;;  %v647_v46 = vld [vmem:[#allocation2 + $0x18] sm:$0xff] (!%p1066_p6)  ;;  %vm946_vm7 = vcmask (!%p1066_p6), 257024  }
 0x175   : > { %v1377_v36 = vld [vmem:[#allocation3] ss:$0 sm:$0xff] (!%p1066_p6)  ;;  %1150 = vmatpush3.bf16.msra.mxu0 (!%p1066_p6), %v783_v35  ;;  %1170 = vmatpush3.bf16.msra.mxu1 (!%p1066_p6), %v783_v35  ;;  %v688_v40 = vshrl.u32 (!%p1066_p6), %v687_v34, 7  ;;  %v654_v47 = vld [vmem:[#allocation2 + $0x50] sm:$0xff] (!%p1066_p6)  ;;  %v655_v52 = vld [vmem:[#allocation2 + $0x58] sm:$0xff] (!%p1066_p6) }
 0x176   : > { %v652_v38 = vld [vmem:[#allocation2 + $0x40] sm:$0xff] (!%p1066_p6)  ;;  %v667_v42 = vsub.f32 (!%p1066_p6), %v644_v32, %v1377_v36  ;;  %v668_v43 = vsub.f32 (!%p1066_p6), %v645_v33, %v1377_v36  ;;  %v676_v50 = vsub.f32 (!%p1066_p6), %v653_v41, %v1377_v36  ;;  %v669_v51 = vsub.f32 (!%p1066_p6), %v646_v45, %v1377_v36  ;;  %v649_v54 = vld [vmem:[#allocation2 + $0x28] sm:$0xff] (!%p1066_p6)  ;;  %v650_v61 = vld [vmem:[#allocation2 + $0x30] sm:$0xff] (!%p1066_p6) }
 0x177   : > { %v684_v39 = vld [vmem:[%s1485_s3] sm:$0x1] (!%p1066_p6)  ;;  %v689_v48 = vsub.s32 (!%p1066_p6), 0, %v688_v40  ;;  %v675_v49 = vsub.f32 (!%p1066_p6), %v652_v38, %v1377_v36  ;;  %v670_v55 = vsub.f32 (!%p1066_p6), %v647_v46, %v1377_v36  ;;  %v677_v56 = vsub.f32 (!%p1066_p6), %v654_v47, %v1377_v36  ;;  %v657_v60 = vld [vmem:[#allocation2 + $0x68] sm:$0xff] (!%p1066_p6)  ;;  %v651_v2 = vld [vmem:[#allocation2 + $0x38] sm:$0xff] (!%p1066_p6) }
 0x178   : > { %v683_v37 = vld [vmem:[#allocation4] sm:$0x1] (!%p1066_p6)  ;;  %v678_v57 = vsub.f32 (!%p1066_p6), %v655_v52, %v1377_v36  ;;  %v672_v63 = vsub.f32 (!%p1066_p6), %v649_v54, %v1377_v36  ;;  %v680_v1 = vsub.f32 (!%p1066_p6), %v657_v60, %v1377_v36  ;;  %v658_v3 = vld [vmem:[#allocation2 + $0x70] sm:$0xff] (!%p1066_p6)  ;;  %v659_v4 = vld [vmem:[#allocation2 + $0x78] sm:$0xff] (!%p1066_p6)  ;;  %v673_v6 = vsub.f32 (!%p1066_p6), %v650_v61, %v1377_v36 }
 0x179   : > { %v685_v44 = vmul.f32 (!%p1066_p6), %v684_v39, %v683_v37  ;;  %v648_v53 = vld [vmem:[#allocation2 + $0x20] sm:$0xff] (!%p1066_p6)  ;;  %v674_v8 = vsub.f32 (!%p1066_p6), %v651_v2, %v1377_v36  ;;  %v681_v9 = vsub.f32 (!%p1066_p6), %v658_v3, %v1377_v36  ;;  %v682_v10 = vsub.f32 (!%p1066_p6), %v659_v4, %v1377_v36 }
 0x17a   : > { %v671_v58 = vsub.f32 (!%p1066_p6), %v648_v53, %v1377_v36  ;;  %v656_v59 = vld [vmem:[#allocation2 + $0x60] sm:$0xff] (!%p1066_p6) }
 0x17b   : > { %v690_v62 = vrot.slane %v685_v44, %v689_v48  ;;  %v679_v0 = vsub.f32 %v656_v59, %v1377_v36  ;;  %v1068_v5 = vld [vmem:[%s1486_s4] ss:$0 sm:$0xff] }
 0x17d   : > { %v692_v11 = vmul.f32 %v690_v62, %v667_v42  ;;  %v693_v12 = vmul.f32 %v690_v62, %v668_v43  ;;  %v700_v13 = vmul.f32 %v690_v62, %v675_v49  ;;  %v701_v14 = vmul.f32 %v690_v62, %v676_v50 }
 0x17e   : > { %v694_v15 = vmul.f32 %v690_v62, %v669_v51  ;;  %v695_v16 = vmul.f32 %v690_v62, %v670_v55  ;;  %v702_v17 = vmul.f32 %v690_v62, %v677_v56  ;;  %v703_v18 = vmul.f32 %v690_v62, %v678_v57 }
 0x17f   : > { %v715_v19 = vadd.f32 %v1068_v5, %v692_v11  ;;  %v716_v7 = vadd.f32 %v1068_v5, %v693_v12  ;;  %v723_v20 = vadd.f32 %v1068_v5, %v700_v13  ;;  %v724_v21 = vadd.f32 %v1068_v5, %v701_v14 }
 0x180   : > { %v717_v22 = vadd.f32 %v1068_v5, %v694_v15  ;;  %v718_v23 = vadd.f32 %v1068_v5, %v695_v16  ;;  %v725_v24 = vadd.f32 %v1068_v5, %v702_v17  ;;  %v726_v25 = vadd.f32 %v1068_v5, %v703_v18 }
 0x181   : > { %v731_v26 = vmax.f32 %v715_v19, 0.0  ;;  %v732_v27 = vmax.f32 %v716_v7, 0.0  ;;  %v739_v28 = vmax.f32 %v723_v20, 0.0  ;;  %v740_v29 = vmax.f32 %v724_v21, 0.0 }
 0x182   : > { %v733_v30 = vmax.f32 %v717_v22, 0.0  ;;  %v734_v31 = vmax.f32 %v718_v23, 0.0  ;;  %v741_v32 = vmax.f32 %v725_v24, 0.0  ;;  %v742_v33 = vmax.f32 %v726_v25, 0.0 }
 0x183   : > { %v747_v34 = vpack.c.bf16 %v732_v27, %v731_v26  ;;  %v751_v35 = vpack.c.bf16 %v740_v29, %v739_v28  ;;  %v696_v36 = vmul.f32 %v690_v62, %v671_v58  ;;  %v697_v37 = vmul.f32 %v690_v62, %v672_v63 }
 0x184   : > { %v748_v38 = vpack.c.bf16 %v734_v31, %v733_v30  ;;  %v752_v39 = vpack.c.bf16 %v742_v33, %v741_v32  ;;  %v704_v40 = vmul.f32 %v690_v62, %v679_v0  ;;  %v705_v41 = vmul.f32 %v690_v62, %v680_v1 }
 0x185   : > { %1151 = vmatprep.mubr.msk.bf16.mxu0 %vm756_vm6, %v747_v34  ;;  %1159 = vmatprep.mubr.msk.bf16.mxu1 %vm756_vm6, %v751_v35  ;;  %v719_v42 = vadd.f32 %v1068_v5, %v696_v36  ;;  %v720_v43 = vadd.f32 %v1068_v5, %v697_v37  ;;  %v698_v44 = vmul.f32 %v690_v62, %v673_v6 }
 0x186   : > { %1152 = vmatmul.mubr.msk.bf16.vlgmr.msra.gmra.mrb[0].mxu0 %vm756_vm6, %v748_v38  ;;  %1160 = vmatmul.mubr.msk.bf16.vlgmr.msra.gmra.mrb[0].mxu1 %vm756_vm6, %v752_v39  ;;  %v727_v45 = vadd.f32 %v1068_v5, %v704_v40  ;;  %v728_v46 = vadd.f32 %v1068_v5, %v705_v41  ;;  %v699_v47 = vmul.f32 %v690_v62, %v674_v8 }
 0x187   : > { %v735_v48 = vmax.f32 %v719_v42, 0.0  ;;  %v736_v49 = vmax.f32 %v720_v43, 0.0  ;;  %v721_v50 = vadd.f32 %v1068_v5, %v698_v44  ;;  %v706_v51 = vmul.f32 %v690_v62, %v681_v9 }
 0x188   : > { %v743_v52 = vmax.f32 %v727_v45, 0.0  ;;  %v744_v53 = vmax.f32 %v728_v46, 0.0  ;;  %v722_v54 = vadd.f32 %v1068_v5, %v699_v47  ;;  %v707_v55 = vmul.f32 %v690_v62, %v682_v10 }
 0x189   : > { %v749_v56 = vpack.c.bf16 %v736_v49, %v735_v48  ;;  %v737_v57 = vmax.f32 %v721_v50, 0.0  ;;  %v729_v58 = vadd.f32 %v1068_v5, %v706_v51 }
 0x18a   : > { %v753_v59 = vpack.c.bf16 %v744_v53, %v743_v52  ;;  %v738_v60 = vmax.f32 %v722_v54, 0.0  ;;  %v730_v61 = vadd.f32 %v1068_v5, %v707_v55 }
 0x18b   : > { %1155 = vmatprep.mubr.msk.bf16.mxu0 %vm756_vm6, %v749_v56  ;;  %v745_v63 = vmax.f32 %v729_v58, 0.0 }
 0x18c   : > { %1163 = vmatprep.mubr.msk.bf16.mxu1 %vm756_vm6, %v753_v59  ;;  %v750_v0 = vpack.c.bf16 %v738_v60, %v737_v57  ;;  %v746_v1 = vmax.f32 %v730_v61, 0.0 }
 0x18e   : > { %1156 = vmatmul.mubr.msk.bf16.gmra.mrb[4].mxu0 %vm756_vm6, %v750_v0  ;;  %v754_v2 = vpack.c.bf16 %v746_v1, %v745_v63 }
 0x190   : > { %1164 = vmatmul.mubr.msk.bf16.gmra.mrb[4].mxu1 %vm756_vm6, %v754_v2 }
 0x259   : > { %v1153_v3 = vpop.f32.mrb[0].mxu0  ;;  %v1161_v62 = vpop.f32.mrb[0].mxu1 }
 0x25a   : > { %v1099_v4 = vpack.c.bf16 %v1153_v3, %v1153_v3  ;;  %v1107_v6 = vpack.c.bf16 %v1161_v62, %v1161_v62  ;;  %v819_v8 = vpop.f32.mrb[1].mxu0  ;;  %v851_v9 = vpop.f32.mrb[1].mxu1 }
 0x25b   : > { %v1097_v5 = vpack.c.bf16 %v819_v8, %v819_v8  ;;  %v1105_v10 = vpack.c.bf16 %v851_v9, %v851_v9  ;;  %v1154_v11 = vpop.f32.mrb[2].mxu0  ;;  %v1162_v12 = vpop.f32.mrb[2].mxu1 }
 0x25c   : > { %949 = vst.msk [vmem:[%s1487_s5 + $0x8] sm:$0xf] %vm946_vm7, %v1099_v4  ;;  %957 = vst.msk [vmem:[%s1487_s5 + $0x28] sm:$0xf] %vm946_vm7, %v1107_v6  ;;  %v1100_v13 = vpack.c.bf16 %v1154_v11, %v1154_v11  ;;  %v1108_v14 = vpack.c.bf16 %v1162_v12, %v1162_v12  ;;  %v822_v15 = vpop.f32.mrb[3].mxu0  ;;  %v854_v16 = vpop.f32.mrb[3].mxu1 }
 0x25d   : > { %947 = vst.msk [vmem:[%s1487_s5] sm:$0xf] %vm946_vm7, %v1097_v5  ;;  %955 = vst.msk [vmem:[%s1487_s5 + $0x20] sm:$0xf] %vm946_vm7, %v1105_v10  ;;  %v1098_v17 = vpack.c.bf16 %v822_v15, %v822_v15  ;;  %v1106_v18 = vpack.c.bf16 %v854_v16, %v854_v16 }
 0x25e   : > { %950 = vst.msk [vmem:[%s1487_s5 + $0xc] sm:$0xf] %vm946_vm7, %v1100_v13  ;;  %958 = vst.msk [vmem:[%s1487_s5 + $0x2c] sm:$0xf] %vm946_vm7, %v1108_v14 }
 0x25f   : > { %948 = vst.msk [vmem:[%s1487_s5 + $0x4] sm:$0xf] %vm946_vm7, %v1098_v17  ;;  %956 = vst.msk [vmem:[%s1487_s5 + $0x24] sm:$0xf] %vm946_vm7, %v1106_v18 }
 0x261   : > { %v1157_v19 = vpop.f32.mrb[4].mxu0 }
 0x262   : > { %v1103_v7 = vpack.c.bf16 %v1157_v19, %v1157_v19  ;;  %v835_v20 = vpop.f32.mrb[5].mxu0 }
 0x263   : > { %v1165_v21 = vpop.f32.mrb[4].mxu1  ;;  %v1101_v22 = vpack.c.bf16 %v835_v20, %v835_v20  ;;  %v1158_v23 = vpop.f32.mrb[6].mxu0 }
 0x264   : > { %953 = vst.msk [vmem:[%s1487_s5 + $0x18] sm:$0xf] %vm946_vm7, %v1103_v7  ;;  %v1111_v24 = vpack.c.bf16 %v1165_v21, %v1165_v21  ;;  %v867_v25 = vpop.f32.mrb[5].mxu1  ;;  %v1104_v26 = vpack.c.bf16 %v1158_v23, %v1158_v23  ;;  %v838_v27 = vpop.f32.mrb[7].mxu0 }
 0x265   : > { %951 = vst.msk [vmem:[%s1487_s5 + $0x10] sm:$0xf] %vm946_vm7, %v1101_v22  ;;  %v1109_v28 = vpack.c.bf16 %v867_v25, %v867_v25  ;;  %v1166_v29 = vpop.f32.mrb[6].mxu1  ;;  %v1102_v30 = vpack.c.bf16 %v838_v27, %v838_v27 }
 0x266   : > { %961 = vst.msk [vmem:[%s1487_s5 + $0x38] sm:$0xf] %vm946_vm7, %v1111_v24  ;;  %954 = vst.msk [vmem:[%s1487_s5 + $0x1c] sm:$0xf] %vm946_vm7, %v1104_v26  ;;  %v1112_v31 = vpack.c.bf16 %v1166_v29, %v1166_v29  ;;  %v870_v32 = vpop.f32.mrb[7].mxu1 }
 0x267   : > { %959 = vst.msk [vmem:[%s1487_s5 + $0x30] sm:$0xf] %vm946_vm7, %v1109_v28  ;;  %952 = vst.msk [vmem:[%s1487_s5 + $0x14] sm:$0xf] %vm946_vm7, %v1102_v30  ;;  %v1110_v33 = vpack.c.bf16 %v870_v32, %v870_v32 }
 0x268   : > { %962 = vst.msk [vmem:[%s1487_s5 + $0x3c] sm:$0xf] %vm946_vm7, %v1112_v31 }
 0x269   : > { %960 = vst.msk [vmem:[%s1487_s5 + $0x34] sm:$0xf] %vm946_vm7, %v1110_v33 }
 0x26a PF: > { %s15_s20 = sadd.s32 1, %s1231_s20   ;;  %s1488_s18 = smov %s1227_s19 }
 0x26b   : > { %p12_p7 = scmp.ge.s32.totalorder %s15_s20, 5   ;;  %s1489_s19 = smov %s1491_s21 }
 0x26d   :  { %14 = sbr.rel (!%p12_p7) target bundleno = 2 (0x2), region = 97 }

</bundles_post_ra>
